<compile_context>
chip_gen: v5e
topology: v5e:2x2
jax: 0.10.0
libtpu: 0.0.40
codegen_flags: <defaults>
</compile_context>

<pallas_src>
import math

import jax
import jax.numpy as jnp
import numpy as np
from jax.experimental import pallas as pl
from jax.experimental.pallas import tpu as pltpu


# ----------------------------- Pallas kernel --------------------------------
def _make_rense_kernel(has_pre, has_att_fc):
    """Build the fused kernel for one batch image.

    Refs (in order):
      x_ref    : (1, c, H*W)   input dtype (f32 or bf16)
      pk_ref   : (H*W, 1) f32  folded pool+conv coefficients
      wfc1_ref : (c//r, c) f32 fc[0].weight  (PyTorch layout, used as-is)
      wfc2_ref : (c, c//r) f32 fc[2].weight
      [pre_ref]: (1, in_c, 1) f32   x[1] column (only if has_pre)
      [watt_ref]: (c, in_c) f32     att_fc.weight (only if in_c != c)
      outx_ref : (1, c, H*W)   input dtype
      att_ref  : (1, c, 1) f32
    """

    def kernel(*refs):
        it = iter(refs)
        x_ref = next(it)
        pk_ref = next(it)
        wfc1_ref = next(it)
        wfc2_ref = next(it)
        pre_ref = next(it) if has_pre else None
        watt_ref = next(it) if has_att_fc else None
        outx_ref = next(it)
        att_ref = next(it)

        # (c, H*W): channels on sublanes, pixels on lanes.  Accumulate in f32.
        xf = x_ref[0].astype(jnp.float32)

        # Adaptive pools 1/2/4 + upsample + both ShareGroupConvs, folded into
        # a single per-pixel-weighted reduction (one MXU matvec).
        z = jnp.dot(xf, pk_ref[...], preferred_element_type=jnp.float32)        # (c, 1)

        # Squeeze-excite MLP in column orientation (weights in PyTorch layout).
        h = jnp.maximum(
            jnp.dot(wfc1_ref[...], z, preferred_element_type=jnp.float32), 0.0)  # (c//r, 1)
        att = jnp.dot(wfc2_ref[...], h, preferred_element_type=jnp.float32)      # (c, 1)

        if has_pre:
            pre = pre_ref[0]                                                     # (in_c, 1)
            if has_att_fc:
                pre = jnp.dot(watt_ref[...], pre, preferred_element_type=jnp.float32)
            att = att + pre

        att_ref[0] = att

        # Final channel scaling: (c,1) lane-broadcast over (c, H*W).
        scale = jax.nn.sigmoid(att)
        outx_ref[0] = (xf * scale).astype(outx_ref.dtype)

    return kernel


# ------------------------ weight folding (plain JAX) ------------------------
def _fold_pool_conv_coeffs(conv1_w, conv2_w, H, W):
    """Fold pools(1/2/4)+nearest-upsample+ShareGroupConv1(k3,valid)
    +ShareGroupConv2(k3,s3,p1) into a per-pixel coefficient vector pk so that
        z_c = sum_{h,w} pk[h*W+w] * x[c, h, w]       (exact, all ops linear)
    """
    w1 = conv1_w.reshape(3, 3, 3).astype(jnp.float32)   # [plane g, u, v]
    w2 = conv2_w.reshape(3, 3).astype(jnp.float32)      # [u, v]

    # conv2 (k3, stride 3, pad 1) on the 2x2 conv1 output touches taps
    # (1,1),(1,2),(2,1),(2,2) of its kernel for the single output position.
    wp = [[w2[1, 1], w2[1, 2]], [w2[2, 1], w2[2, 2]]]    # wp[p][q]

    # Coefficients of the 4x4 block means m4[a][b] coming through the y4 plane.
    K4 = [[0.0] * 4 for _ in range(4)]
    # Coefficients of the 2x2 means m2[r][s] through the y2 plane.
    K2 = [[0.0] * 2 for _ in range(2)]
    for p in range(2):
        for q in range(2):
            for u in range(3):
                for v in range(3):
                    K4[p + u][q + v] = K4[p + u][q + v] + wp[p][q] * w1[2, u, v]
                    K2[(p + u) // 2][(q + v) // 2] = (
                        K2[(p + u) // 2][(q + v) // 2] + wp[p][q] * w1[1, u, v])
    # Coefficient of the global mean m1 through the y1 plane.
    K1 = (wp[0][0] + wp[0][1] + wp[1][0] + wp[1][1]) * jnp.sum(w1[0])

    # m2[r][s] = mean of its 4 m4 cells; m1 = mean of all 16 m4 cells.
    kt_rows = []
    for a in range(4):
        kt_rows.append(jnp.stack(
            [K4[a][b] + 0.25 * K2[a // 2][b // 2] + (1.0 / 16.0) * K1
             for b in range(4)]))
    kt = jnp.stack(kt_rows)                              # (4, 4)

    bh, bw = H // 4, W // 4
    pk = jnp.repeat(jnp.repeat(kt, bh, axis=0), bw, axis=1) / float(bh * bw)  # (H, W)
    return pk.reshape(H * W, 1)


# --------------------------------- wrapper -----------------------------------
def rense_layer_pallas(x0, x1, params, *, donate_x=False):
    """RENSELayer.forward({0: x0, 1: x1}).  x0 is NCHW (PyTorch layout).

    Returns {0: scaled x0 (same dtype as x0), 1: all_att (b, c) float32}.
    Configuration (in_channel / channel / reduction) is inferred from shapes.
    """
    b, c, H, W = x0.shape
    assert H % 4 == 0 and W % 4 == 0, \
        "adaptive-pool decomposition requires H % 4 == 0 and W % 4 == 0"
    HW = H * W
    hdim = params["fc1_w"].shape[0]

    has_pre = x1 is not None
    in_c = x1.shape[1] if has_pre else c
    has_att_fc = has_pre and (in_c != c)

    # Free (bitcast) reshape: no HBM transpose passes around the kernel.
    x_flat = x0.reshape(b, c, HW)

    pk = _fold_pool_conv_coeffs(params["conv1_w"], params["conv2_w"], H, W)
    wfc1 = params["fc1_w"].astype(jnp.float32)           # (c//r, c)
    wfc2 = params["fc2_w"].astype(jnp.float32)           # (c, c//r)

    operands = [x_flat, pk, wfc1, wfc2]
    in_specs = [
        pl.BlockSpec((1, c, HW), lambda i: (i, 0, 0)),    # per-image block (pipelined)
        pl.BlockSpec((HW, 1), lambda i: (0, 0)),          # resident small tensors
        pl.BlockSpec((hdim, c), lambda i: (0, 0)),
        pl.BlockSpec((c, hdim), lambda i: (0, 0)),
    ]
    if has_pre:
        operands.append(x1.astype(jnp.float32)[:, :, None])        # (b, in_c, 1)
        in_specs.append(pl.BlockSpec((1, in_c, 1), lambda i: (i, 0, 0)))
    if has_att_fc:
        operands.append(params["att_fc_w"].astype(jnp.float32))    # (c, in_c)
        in_specs.append(pl.BlockSpec((c, in_c), lambda i: (0, 0)))

    out_shape = (jax.ShapeDtypeStruct((b, c, HW), x0.dtype),
                 jax.ShapeDtypeStruct((b, c, 1), jnp.float32))
    out_specs = (pl.BlockSpec((1, c, HW), lambda i: (i, 0, 0)),
                 pl.BlockSpec((1, c, 1), lambda i: (i, 0, 0)))

    outx_flat, att3 = pl.pallas_call(
        _make_rense_kernel(has_pre, has_att_fc),
        grid=(b,),
        in_specs=in_specs,
        out_specs=out_specs,
        out_shape=out_shape,
        compiler_params=pltpu.CompilerParams(
            dimension_semantics=("parallel",),            # megacore on v7x
            vmem_limit_bytes=32 * 1024 * 1024),           # helps v5e's 16 MiB default
        input_output_aliases=({0: 0} if donate_x else {}),
    )(*operands)

    return {0: outx_flat.reshape(b, c, H, W), 1: att3[:, :, 0]}


# ----------------------- independent pure-JAX reference ----------------------
def _conv_nchw(x, w, stride, padding):
    return jax.lax.conv_general_dilated(
        x, w, window_strides=(stride, stride), padding=padding,
        dimension_numbers=("NCHW", "OIHW", "NCHW"))


def rense_layer_reference(x0, x1, params, in_channel, channel):
    b, c, H, W = x0.shape
    y1 = jnp.mean(x0, axis=(2, 3), keepdims=True)
    y1 = jnp.broadcast_to(y1, (b, c, 4, 4))
    y2 = x0.reshape(b, c, 2, H // 2, 2, W // 2).mean(axis=(3, 5))
    y2 = jnp.repeat(jnp.repeat(y2, 2, axis=2), 2, axis=3)
    y4 = x0.reshape(b, c, 4, H // 4, 4, W // 4).mean(axis=(3, 5))
    y = jnp.concatenate([y1, y2, y4], axis=1)

    outs = [_conv_nchw(y[:, j::c], params["conv1_w"], 1, "VALID") for j in range(c)]
    s = jnp.concatenate(outs, axis=1)                             # (b, c, 2, 2)
    outs2 = [_conv_nchw(s[:, j:j + 1], params["conv2_w"], 3, [(1, 1), (1, 1)])
             for j in range(c)]
    z = jnp.concatenate(outs2, axis=1).reshape(b, c)

    h = jnp.maximum(z @ params["fc1_w"].T, 0.0)
    fc_out = h @ params["fc2_w"].T
    if x1 is None:
        all_att = fc_out
    else:
        pre = (x1 @ params["att_fc_w"].T) if in_channel != channel else x1
        all_att = fc_out + pre
    scale = jax.nn.sigmoid(all_att).reshape(b, c, 1, 1)
    return {0: x0 * scale, 1: all_att}


if __name__ == "__main__":
    b, H, W = 2, 16, 16
    in_channel, channel, reduction = 16, 32, 16
    hidden = channel // reduction

    key = jax.random.PRNGKey(0)
    kx, kp, k1, k2, k3, k4, k5 = jax.random.split(key, 7)

    x0 = jax.random.normal(kx, (b, channel, H, W), jnp.float32)
    x1 = jax.random.normal(kp, (b, in_channel), jnp.float32)

    params = {
        "conv1_w": jax.random.normal(k1, (1, 3, 3, 3), jnp.float32) / math.sqrt(27.0),
        "conv2_w": jax.random.normal(k2, (1, 1, 3, 3), jnp.float32) / 3.0,
        "fc1_w": jax.random.normal(k3, (hidden, channel), jnp.float32) / math.sqrt(channel),
        "fc2_w": jax.random.normal(k4, (channel, hidden), jnp.float32) / math.sqrt(hidden),
        "att_fc_w": jax.random.normal(k5, (channel, in_channel), jnp.float32) / math.sqrt(in_channel),
    }

    rense = jax.jit(rense_layer_pallas, static_argnames=("donate_x",))

    # 1) f32, pre-attention through att_fc (in_channel != channel)
    out = rense(x0, x1, params)
    jax.block_until_ready(out[0])
    jax.block_until_ready(out[1])
    ref = rense_layer_reference(x0, x1, params, in_channel, channel)
    np.testing.assert_allclose(np.asarray(out[0]), np.asarray(ref[0]), rtol=1e-4, atol=1e-4)
    np.testing.assert_allclose(np.asarray(out[1]), np.asarray(ref[1]), rtol=1e-4, atol=1e-4)

    # 2) f32, x[1] is None
    out_n = rense(x0, None, params)
    ref_n = rense_layer_reference(x0, None, params, in_channel, channel)
    np.testing.assert_allclose(np.asarray(out_n[0]), np.asarray(ref_n[0]), rtol=1e-4, atol=1e-4)
    np.testing.assert_allclose(np.asarray(out_n[1]), np.asarray(ref_n[1]), rtol=1e-4, atol=1e-4)

    # 3) f32, in_channel == channel (pre-attention added directly, no att_fc)
    x1_same = jax.random.normal(kp, (b, channel), jnp.float32)
    out_s = rense(x0, x1_same, params)
    ref_s = rense_layer_reference(x0, x1_same, params, channel, channel)
    np.testing.assert_allclose(np.asarray(out_s[0]), np.asarray(ref_s[0]), rtol=1e-4, atol=1e-4)
    np.testing.assert_allclose(np.asarray(out_s[1]), np.asarray(ref_s[1]), rtol=1e-4, atol=1e-4)

    # 4) bf16 activations over HBM (f32 accumulation inside the kernel)
    out_b = rense(x0.astype(jnp.bfloat16), x1, params)
    assert out_b[0].dtype == jnp.bfloat16 and out_b[1].dtype == jnp.float32
    np.testing.assert_allclose(np.asarray(out_b[0].astype(jnp.float32)), np.asarray(ref[0]),
                               rtol=5e-2, atol=5e-2)
    np.testing.assert_allclose(np.asarray(out_b[1]), np.asarray(ref[1]), rtol=5e-2, atol=5e-2)

    print("KERNEL_OK")
</pallas_src>

<mosaic_0001>
module attributes {stable_mosaic.version = 11 : i64} {
  func.func @kernel(%arg0: i32, %arg1: memref<1x32x256xf32, #tpu.memory_space<vmem>>, %arg2: memref<256x1xf32, #tpu.memory_space<vmem>>, %arg3: memref<2x32xf32, #tpu.memory_space<vmem>>, %arg4: memref<32x2xf32, #tpu.memory_space<vmem>>, %arg5: memref<1x16x1xf32, #tpu.memory_space<vmem>>, %arg6: memref<32x16xf32, #tpu.memory_space<vmem>>, %arg7: memref<1x32x256xf32, #tpu.memory_space<vmem>>, %arg8: memref<1x32x1xf32, #tpu.memory_space<vmem>>) attributes {dimension_semantics = [#tpu.dimension_semantics<parallel>], iteration_bounds = array<i64: 2>, scalar_prefetch = 0 : i64, scratch_operands = 0 : i64, tpu.core_type = #tpu.core_type<tc>, window_params = [{transform_indices = @transform_0, window_bounds = array<i64: 1, 32, 256>}, {pipeline_mode = #tpu.pipeline_mode<synchronous>, transform_indices = @transform_1, window_bounds = array<i64: 256, 1>}, {pipeline_mode = #tpu.pipeline_mode<synchronous>, transform_indices = @transform_2, window_bounds = array<i64: 2, 32>}, {pipeline_mode = #tpu.pipeline_mode<synchronous>, transform_indices = @transform_3, window_bounds = array<i64: 32, 2>}, {transform_indices = @transform_4, window_bounds = array<i64: 1, 16, 1>}, {pipeline_mode = #tpu.pipeline_mode<synchronous>, transform_indices = @transform_5, window_bounds = array<i64: 32, 16>}, {transform_indices = @transform_6, window_bounds = array<i64: 1, 32, 256>}, {transform_indices = @transform_7, window_bounds = array<i64: 1, 32, 1>}]} {
    %c0 = arith.constant 0 : index
    %c0_0 = arith.constant 0 : index
    %c0_1 = arith.constant 0 : index
    %0 = vector.load %arg1[%c0, %c0_0, %c0_1] : memref<1x32x256xf32, #tpu.memory_space<vmem>>, vector<1x32x256xf32>
    %1 = vector.shape_cast %0 : vector<1x32x256xf32> to vector<32x256xf32>
    %c0_2 = arith.constant 0 : index
    %c0_3 = arith.constant 0 : index
    %2 = vector.load %arg2[%c0_2, %c0_3] : memref<256x1xf32, #tpu.memory_space<vmem>>, vector<256x1xf32>
    %cst = arith.constant dense<0.000000e+00> : vector<32x1xf32>
    %3 = tpu.matmul %1, %2, %cst {dimension_numbers = #tpu.dot_dimension_numbers<[1], [0], [0], [1], [0, 0, 1, 1], [], []>} : vector<32x256xf32>, vector<256x1xf32>, vector<32x1xf32> -> vector<32x1xf32>
    %c0_4 = arith.constant 0 : index
    %c0_5 = arith.constant 0 : index
    %4 = vector.load %arg3[%c0_4, %c0_5] : memref<2x32xf32, #tpu.memory_space<vmem>>, vector<2x32xf32>
    %cst_6 = arith.constant dense<0.000000e+00> : vector<2x1xf32>
    %5 = tpu.matmul %4, %3, %cst_6 {dimension_numbers = #tpu.dot_dimension_numbers<[1], [0], [0], [1], [0, 0, 1, 1], [], []>} : vector<2x32xf32>, vector<32x1xf32>, vector<2x1xf32> -> vector<2x1xf32>
    %cst_7 = arith.constant 0.000000e+00 : f32
    %6 = vector.broadcast %cst_7 : f32 to vector<2x1xf32>
    %7 = arith.maximumf %5, %6 : vector<2x1xf32>
    %c0_8 = arith.constant 0 : index
    %c0_9 = arith.constant 0 : index
    %8 = vector.load %arg4[%c0_8, %c0_9] : memref<32x2xf32, #tpu.memory_space<vmem>>, vector<32x2xf32>
    %cst_10 = arith.constant dense<0.000000e+00> : vector<32x1xf32>
    %9 = tpu.matmul %8, %7, %cst_10 {dimension_numbers = #tpu.dot_dimension_numbers<[1], [0], [0], [1], [0, 0, 1, 1], [], []>} : vector<32x2xf32>, vector<2x1xf32>, vector<32x1xf32> -> vector<32x1xf32>
    %c0_11 = arith.constant 0 : index
    %c0_12 = arith.constant 0 : index
    %c0_13 = arith.constant 0 : index
    %10 = vector.load %arg5[%c0_11, %c0_12, %c0_13] : memref<1x16x1xf32, #tpu.memory_space<vmem>>, vector<1x16x1xf32>
    %11 = vector.shape_cast %10 : vector<1x16x1xf32> to vector<16x1xf32>
    %c0_14 = arith.constant 0 : index
    %c0_15 = arith.constant 0 : index
    %12 = vector.load %arg6[%c0_14, %c0_15] : memref<32x16xf32, #tpu.memory_space<vmem>>, vector<32x16xf32>
    %cst_16 = arith.constant dense<0.000000e+00> : vector<32x1xf32>
    %13 = tpu.matmul %12, %11, %cst_16 {dimension_numbers = #tpu.dot_dimension_numbers<[1], [0], [0], [1], [0, 0, 1, 1], [], []>} : vector<32x16xf32>, vector<16x1xf32>, vector<32x1xf32> -> vector<32x1xf32>
    %14 = arith.addf %9, %13 : vector<32x1xf32>
    %c0_17 = arith.constant 0 : index
    %c0_18 = arith.constant 0 : index
    %c0_19 = arith.constant 0 : index
    %15 = vector.load %arg8[%c0_17, %c0_18, %c0_19] : memref<1x32x1xf32, #tpu.memory_space<vmem>>, vector<1x32x1xf32>
    %16 = vector.shape_cast %15 : vector<1x32x1xf32> to vector<32x1xf32>
    %17 = vector.shape_cast %14 : vector<32x1xf32> to vector<1x32x1xf32>
    tpu.vector_store %arg8[%c0_17, %c0_18, %c0_19], %17 {strides = array<i32>} : memref<1x32x1xf32, #tpu.memory_space<vmem>>, vector<1x32x1xf32>,
    %18 = arith.negf %14 : vector<32x1xf32>
    %19 = math.exp %18 : vector<32x1xf32>
    %cst_20 = arith.constant 1.000000e+00 : f32
    %20 = vector.broadcast %cst_20 : f32 to vector<32x1xf32>
    %21 = arith.addf %20, %19 : vector<32x1xf32>
    %22 = arith.divf %20, %21 : vector<32x1xf32>
    %23 = vector.broadcast %22 : vector<32x1xf32> to vector<32x256xf32>
    %24 = arith.mulf %1, %23 : vector<32x256xf32>
    %c0_21 = arith.constant 0 : index
    %c0_22 = arith.constant 0 : index
    %c0_23 = arith.constant 0 : index
    %25 = vector.load %arg7[%c0_21, %c0_22, %c0_23] : memref<1x32x256xf32, #tpu.memory_space<vmem>>, vector<1x32x256xf32>
    %26 = vector.shape_cast %25 : vector<1x32x256xf32> to vector<32x256xf32>
    %27 = vector.shape_cast %24 : vector<32x256xf32> to vector<1x32x256xf32>
    tpu.vector_store %arg7[%c0_21, %c0_22, %c0_23], %27 {strides = array<i32>} : memref<1x32x256xf32, #tpu.memory_space<vmem>>, vector<1x32x256xf32>,
    return
  }
  func.func @transform_0(%arg0: i32) -> (i32, i32, i32) {
    %c0_i32 = arith.constant 0 : i32
    %c0_i32_0 = arith.constant 0 : i32
    %c0_i32_1 = arith.constant 0 : i32
    return %arg0, %c0_i32, %c0_i32_0 : i32, i32, i32
  }
  func.func @transform_1(%arg0: i32) -> (i32, i32) {
    %c0_i32 = arith.constant 0 : i32
    %c0_i32_0 = arith.constant 0 : i32
    %c0_i32_1 = arith.constant 0 : i32
    return %c0_i32, %c0_i32_0 : i32, i32
  }
  func.func @transform_2(%arg0: i32) -> (i32, i32) {
    %c0_i32 = arith.constant 0 : i32
    %c0_i32_0 = arith.constant 0 : i32
    %c0_i32_1 = arith.constant 0 : i32
    return %c0_i32, %c0_i32_0 : i32, i32
  }
  func.func @transform_3(%arg0: i32) -> (i32, i32) {
    %c0_i32 = arith.constant 0 : i32
    %c0_i32_0 = arith.constant 0 : i32
    %c0_i32_1 = arith.constant 0 : i32
    return %c0_i32, %c0_i32_0 : i32, i32
  }
  func.func @transform_4(%arg0: i32) -> (i32, i32, i32) {
    %c0_i32 = arith.constant 0 : i32
    %c0_i32_0 = arith.constant 0 : i32
    %c0_i32_1 = arith.constant 0 : i32
    return %arg0, %c0_i32, %c0_i32_0 : i32, i32, i32
  }
  func.func @transform_5(%arg0: i32) -> (i32, i32) {
    %c0_i32 = arith.constant 0 : i32
    %c0_i32_0 = arith.constant 0 : i32
    %c0_i32_1 = arith.constant 0 : i32
    return %c0_i32, %c0_i32_0 : i32, i32
  }
  func.func @transform_6(%arg0: i32) -> (i32, i32, i32) {
    %c0_i32 = arith.constant 0 : i32
    %c0_i32_0 = arith.constant 0 : i32
    %c0_i32_1 = arith.constant 0 : i32
    return %arg0, %c0_i32, %c0_i32_0 : i32, i32, i32
  }
  func.func @transform_7(%arg0: i32) -> (i32, i32, i32) {
    %c0_i32 = arith.constant 0 : i32
    %c0_i32_0 = arith.constant 0 : i32
    %c0_i32_1 = arith.constant 0 : i32
    return %arg0, %c0_i32, %c0_i32_0 : i32, i32, i32
  }
}

</mosaic_0001>

<bundles_post_ra>
// kernel: rense_layer_pallas.1
= control target key start
LH: loop header
LB: loop body
LE: loop exit
PB: predicated region body
PF: predicated region fallthrough
CT: control target
= control target key end

     0   :  { %s860_s24 = smov 0   ;;  %s1061_s0 = inlined_call_operand.vmem [shape: f32[2,32,256], index: 0, kind: input, shape index: {}]   ;;  %s1062_s1 = inlined_call_operand.vmem [shape: f32[256,1], index: 1, kind: input, shape index: {}]   ;;  %s1063_s2 = inlined_call_operand.vmem [shape: f32[2,32], index: 2, kind: input, shape index: {}]   ;;  %s1064_s3 = inlined_call_operand.vmem [shape: f32[32,2], index: 3, kind: input, shape index: {}]   ;;  %s1065_s4 = inlined_call_operand.vmem [shape: f32[2,16,1], index: 4, kind: input, shape index: {}]   ;;  %s1066_s5 = inlined_call_operand.vmem [shape: f32[32,16], index: 5, kind: input, shape index: {}]   ;;  %s1067_s6 = inlined_call_operand.vmem [shape: f32[2,32,256], index: 6, kind: output, shape index: {0}]   ;;  %s1068_s7 = inlined_call_operand.vmem [shape: f32[2,32,1], index: 7, kind: output, shape index: {1}]  }
   0x1 LB: > { %s751_s25 = sadd.s32 4294967295, %s817_s24   ;;  %p755_p0 = scmp.ge.s32.totalorder %s817_s24, 1  ;;  %s817_s24 = sphi %s860_s24, %s18_s24  }
   0x2   : > { %p250_p1 = scmp.lt.s32.totalorder %s817_s24, 3 }
   0x4   : > { %p251_p2 = pnand %p755_p0, %p250_p1 }
   0x5   : > { %p292_p3 = scmp.lt.s32.totalorder (!%p251_p2), %s751_s25, 1 }
   0x6   : > { %254 = sbr.rel (%p251_p2) target bundleno = 643 (0x283), region = 44 }
   0xb   : > { %v335_v0 = vld [vmem:[%s1062_s1 + $0x78] sm:$0xff]  ;;  %v334_v2 = vld [vmem:[%s1062_s1 + $0x70] sm:$0xff]  ;;  %v333_v4 = vld [vmem:[%s1062_s1 + $0x68] sm:$0xff]  ;;  %s1070_s25 = smov (!%p292_p3, %s751_s25), 1  ;;  %vm411_vm0 = vcmask 261120   ;;  %vm446_vm1 = vcmask 130048  }
   0xc   : > { %v351_v1 = vld [vmem:[%s1062_s1 + $0xf8] sm:$0xff]  ;;  %352 = vmatpush.msra.mxu0 %v335_v0  ;;  %v350_v3 = vld [vmem:[%s1062_s1 + $0xf0] sm:$0xff]  ;;  %v349_v5 = vld [vmem:[%s1062_s1 + $0xe8] sm:$0xff]  ;;  %s780_s13 = sshll.u32 %s1070_s25, 6  ;;  %s781_s10 = sshll.u32 %s1070_s25, 4  ;;  %vm501_vm2 = vcmask 1041408  }
   0xd   : > { %381 = vmatpush.msra.mxu1 %v351_v1  ;;  %v332_v6 = vld [vmem:[%s1062_s1 + $0x60] sm:$0xff]  ;;  %v331_v8 = vld [vmem:[%s1062_s1 + $0x58] sm:$0xff]  ;;  %v330_v10 = vld [vmem:[%s1062_s1 + $0x50] sm:$0xff]  ;;  %s296_s26 = scalar_lea.vmem %s1061_s0, %s780_s13  ;;  %s301_s14 = scalar_lea.vmem %s1065_s4, %s781_s10  ;;  %vm488_vm3 = vcmask 15360   ;;  %vm534_vm4 = vcmask 7168  }
   0xe   : > { %353 = vmatpush.msra.mxu0 %v334_v2  ;;  %v348_v7 = vld [vmem:[%s1062_s1 + $0xe0] sm:$0xff]  ;;  %v347_v9 = vld [vmem:[%s1062_s1 + $0xd8] sm:$0xff]  ;;  %v346_v11 = vld [vmem:[%s1062_s1 + $0xd0] sm:$0xff]  ;;  %s783_s10 = sshll.u32 %s1070_s25, 5  ;;  %v819_v2 = vmov 0   ;;  %s306_s17 = scalar_lea.vmem %s1067_s6, %s780_s13 }
   0xf   : > { %382 = vmatpush.msra.mxu1 %v350_v3  ;;  %v329_v12 = vld [vmem:[%s1062_s1 + $0x48] sm:$0xff]  ;;  %v328_v14 = vld [vmem:[%s1062_s1 + $0x40] sm:$0xff]  ;;  %v327_v16 = vld [vmem:[%s1062_s1 + $0x38] sm:$0xff]  ;;  %793 = vset.pattern.permute.xlu0 %v819_v2 }
  0x10   : > { %354 = vmatpush.msra.mxu0 %v333_v4  ;;  %v345_v13 = vld [vmem:[%s1062_s1 + $0xc8] sm:$0xff]  ;;  %v344_v15 = vld [vmem:[%s1062_s1 + $0xc0] sm:$0xff]  ;;  %v343_v17 = vld [vmem:[%s1062_s1 + $0xb8] sm:$0xff]  ;;  %794 = vset.pattern.permute.xlu1 %v819_v2 }
  0x11   : > { %383 = vmatpush.msra.mxu1 %v349_v5  ;;  %v326_v18 = vld [vmem:[%s1062_s1 + $0x30] sm:$0xff]  ;;  %v325_v20 = vld [vmem:[%s1062_s1 + $0x28] sm:$0xff]  ;;  %v324_v22 = vld [vmem:[%s1062_s1 + $0x20] sm:$0xff] }
  0x12   : > { %355 = vmatpush.msra.mxu0 %v332_v6  ;;  %v342_v19 = vld [vmem:[%s1062_s1 + $0xb0] sm:$0xff]  ;;  %v341_v21 = vld [vmem:[%s1062_s1 + $0xa8] sm:$0xff]  ;;  %v340_v23 = vld [vmem:[%s1062_s1 + $0xa0] sm:$0xff] }
  0x13   : > { %384 = vmatpush.msra.mxu1 %v348_v7  ;;  %v323_v24 = vld [vmem:[%s1062_s1 + $0x18] sm:$0xff]  ;;  %v322_v26 = vld [vmem:[%s1062_s1 + $0x10] sm:$0xff]  ;;  %v321_v28 = vld [vmem:[%s1062_s1 + $0x8] sm:$0xff] }
  0x14   : > { %356 = vmatpush.msra.mxu0 %v331_v8  ;;  %v339_v25 = vld [vmem:[%s1062_s1 + $0x98] sm:$0xff]  ;;  %v338_v27 = vld [vmem:[%s1062_s1 + $0x90] sm:$0xff]  ;;  %v337_v29 = vld [vmem:[%s1062_s1 + $0x88] sm:$0xff] }
  0x15   : > { %385 = vmatpush.msra.mxu1 %v347_v9  ;;  %v320_v30 = vld [vmem:[%s1062_s1] sm:$0xff]  ;;  %v978_v33 = vld [vmem:[%s296_s26 + $0x8] sm:$0xff]  ;;  %v982_v34 = vld [vmem:[%s296_s26 + $0x10] sm:$0xff] }
  0x16   : > { %357 = vmatpush.msra.mxu0 %v330_v10  ;;  %v336_v31 = vld [vmem:[%s1062_s1 + $0x80] sm:$0xff]  ;;  %v984_v35 = vld [vmem:[%s296_s26 + $0x18] sm:$0xff]  ;;  %v990_v37 = vld [vmem:[%s296_s26 + $0x28] sm:$0xff] }
  0x17   : > { %386 = vmatpush.msra.mxu1 %v346_v11  ;;  %v976_v32 = vld [vmem:[%s296_s26] sm:$0xff]  ;;  %v994_v38 = vld [vmem:[%s296_s26 + $0x30] sm:$0xff]  ;;  %v996_v39 = vld [vmem:[%s296_s26 + $0x38] sm:$0xff] }
  0x18   : > { %358 = vmatpush.msra.mxu0 %v329_v12  ;;  %v988_v36 = vld [vmem:[%s296_s26 + $0x20] sm:$0xff]  ;;  %v441_v53 = vld [vmem:[%s301_s14 + $0x8] sm:$0xff]  ;;  %v444_v57 = vld [vmem:[%s1066_s5 + $0x10] sm:$0xff] }
  0x19   : > { %387 = vmatpush.msra.mxu1 %v345_v13  ;;  %v410_v52 = vld [vmem:[%s1063_s2] sm:$0x3]  ;;  %473 = vmatpush.msra.mxu3 %v441_v53  ;;  %v443_v56 = vld [vmem:[%s1066_s5 + $0x8] sm:$0xff]  ;;  %v445_v58 = vld [vmem:[%s1066_s5 + $0x18] sm:$0xff] }
  0x1a   : > { %359 = vmatpush.msra.mxu0 %v328_v14  ;;  %v440_v54 = vld [vmem:[%s301_s14] sm:$0xff]  ;;  %v437_v62 = vld [vmem:[%s1064_s3 + $0x8] sm:$0xff]  ;;  %v438_v63 = vld [vmem:[%s1064_s3 + $0x10] sm:$0xff]  ;;  %s1035_s14 = scalar_lea.vmem %s1068_s7, %s783_s10 }
  0x1b   : > { %388 = vmatpush.msra.mxu1 %v344_v15  ;;  %474 = vmatpush.msra.mxu3 %v440_v54  ;;  %v442_v55 = vld [vmem:[%s1066_s5] sm:$0xff]  ;;  %v439_v0 = vld [vmem:[%s1064_s3 + $0x18] sm:$0xff] }
  0x1c   : > { %360 = vmatpush.msra.mxu0 %v327_v16  ;;  %765 = vmatmul.msk.f32.vlgmr.msra.gmra.mxu3 %vm446_vm1, %v442_v55  ;;  %v436_v61 = vld [vmem:[%s1064_s3] sm:$0xff] }
  0x1d   : > { %389 = vmatpush.msra.mxu1 %v343_v17 }
  0x1e   : > { %361 = vmatpush.msra.mxu0 %v326_v18 }
  0x1f   : > { %390 = vmatpush.msra.mxu1 %v342_v19 }
  0x20   : > { %362 = vmatpush.msra.mxu0 %v325_v20 }
  0x21   : > { %391 = vmatpush.msra.mxu1 %v341_v21 }
  0x22   : > { %363 = vmatpush.msra.mxu0 %v324_v22 }
  0x23   : > { %392 = vmatpush.msra.mxu1 %v340_v23 }
  0x24   : > { %364 = vmatpush.msra.mxu0 %v323_v24  ;;  %766 = vmatmul.msk.f32.gmra.mxu3 %vm446_vm1, %v443_v56 }
  0x25   : > { %393 = vmatpush.msra.mxu1 %v339_v25 }
  0x26   : > { %365 = vmatpush.msra.mxu0 %v322_v26 }
  0x27   : > { %394 = vmatpush.msra.mxu1 %v338_v27 }
  0x28   : > { %366 = vmatpush.msra.mxu0 %v321_v28 }
  0x29   : > { %395 = vmatpush.msra.mxu1 %v337_v29 }
  0x2a   : > { %367 = vmatpush.msra.mxu0 %v320_v30 }
  0x2b   : > { %396 = vmatpush.msra.mxu1 %v336_v31  ;;  %368 = vmatmul.f32.vlgmr.msra.gmra.mxu0 %v976_v32 }
  0x2c   : > { %397 = vmatmul.f32.vlgmr.msra.gmra.mxu1 %v978_v33  ;;  %767 = vmatmul.msk.f32.gmra.mxu3 %vm446_vm1, %v444_v57 }
  0x33   : > { %371 = vmatmul.f32.gmra.mxu0 %v982_v34 }
  0x34   : > { %400 = vmatmul.f32.gmra.mxu1 %v984_v35  ;;  %768 = vmatmul.msk.f32.gmra.mxu3 %vm446_vm1, %v445_v58 }
  0x3b   : > { %374 = vmatmul.f32.gmra.mxu0 %v988_v36 }
  0x3c   : > { %403 = vmatmul.f32.gmra.mxu1 %v990_v37 }
  0x43   : > { %377 = vmatmul.f32.gmra.mxu0 %v994_v38 }
  0x44   : > { %406 = vmatmul.f32.gmra.mxu1 %v996_v39 }
  0x9f   : > { %v476_v1 = vpop.f32.mrf.mxu3 }
  0xa7   : > { %v479_v5 = vpop.f32.mrf.mxu3 }
  0xa8   : > { %v369_v40 = vpop.f32.mrf.mxu0 }
  0xa9   : > { %v398_v41 = vpop.f32.mrf.mxu1 }
  0xaa   : > { %v399_v51 = vadd.f32 %v398_v41, %v369_v40 }
  0xaf   : > { %v482_v12 = vpop.f32.mrf.mxu3 }
  0xb0   : > { %v372_v42 = vpop.f32.mrf.mxu0 }
  0xb1   : > { %v401_v43 = vpop.f32.mrf.mxu1 }
  0xb2   : > { %v402_v50 = vadd.f32 %v401_v43, %v372_v42 }
  0xb7   : > { %v485_v20 = vpop.f32.mrf.mxu3 }
  0xb8   : > { %v375_v44 = vpop.f32.mrf.mxu0 }
  0xb9   : > { %v404_v45 = vpop.f32.mrf.mxu1 }
  0xba   : > { %v405_v49 = vadd.f32 %v404_v45, %v375_v44 }
  0xc0   : > { %v378_v46 = vpop.f32.mrf.mxu0 }
  0xc1   : > { %v407_v47 = vpop.f32.mrf.mxu1 }
  0xc2   : > { %v408_v48 = vadd.f32 %v407_v47, %v378_v46 }
  0xc4   : > { %427 = vmatpush.msra.mxu2 %v408_v48 }
  0xc6   : > { %428 = vmatpush.msra.mxu2 %v405_v49 }
  0xc8   : > { %429 = vmatpush.msra.mxu2 %v402_v50 }
  0xca   : > { %430 = vmatpush.msra.mxu2 %v399_v51 }
  0xcb   : > { %764 = vmatmul.msk.f32.vlgmr.msra.gmra.mxu2 %vm411_vm0, %v410_v52 }
 0x14e   : > { %v432_v59 = vpop.f32.mrf.mxu2 }
 0x14f   : > { %v435_v60 = vmax.f32 %v432_v59, 0.0 }
 0x151   : > { %769 = vmatpush.msk.msrb.mxu2 %vm501_vm2, %v435_v60 }
 0x152   : > { %770 = vmatmul.msk.f32.vlgmr.msrb.gmra.mxu2 %vm488_vm3, %v436_v61 }
 0x15a   : > { %771 = vmatmul.msk.f32.gmra.mxu2 %vm488_vm3, %v437_v62 }
 0x162   : > { %772 = vmatmul.msk.f32.gmra.mxu2 %vm488_vm3, %v438_v63 }
 0x16a   : > { %773 = vmatmul.msk.f32.gmra.mxu2 %vm488_vm3, %v439_v0 }
 0x1d5   : > { %v522_v3 = vpop.f32.mrf.mxu2 }
 0x1d6   : > { %v523_v4 = vadd.f32 %v522_v3, %v476_v1 }
 0x1d8   : > { %535 = vst.msk [vmem:[%s1035_s14] sm:$0xff] %vm534_vm4, %v523_v4  ;;  %v774_v6 = vmul.f32 -1.442695, %v523_v4 }
 0x1da   : > { %795 = vpow2.f32 %v774_v6 }
 0x1dd   : > { %v525_v7 = vpop.f32.mrf.mxu2 }
 0x1de   : > { %v526_v8 = vadd.f32 %v525_v7, %v479_v5 }
 0x1e0   : > { %v796_v9 = vpop.eup %795  ;;  %536 = vst.msk [vmem:[%s1035_s14 + $0x8] sm:$0xff] %vm534_vm4, %v526_v8  ;;  %v775_v10 = vmul.f32 -1.442695, %v526_v8 }
 0x1e1   : > { %v551_v11 = vadd.f32 1.0, %v796_v9 }
 0x1e2   : > { %797 = vpow2.f32 %v775_v10 }
 0x1e3   : > { %799 = vrcp.f32 %v551_v11  ;;  %v566_v23 = vand.u32 2147483648, %v551_v11  ;;  %v564_v26 = vand.u32 2147483647, %v551_v11  ;;  %vm560_vm6 = vweird.f32 %v551_v11 }
 0x1e5   : > { %v528_v13 = vpop.f32.mrf.mxu2  ;;  %v567_v40 = vor.u32 1.1754944e-38, %v566_v23  ;;  %vm565_vm8 = vcmp.eq.f32.partialorder %v564_v26, 8.507059e+37 }
 0x1e6   : > { %v529_v14 = vadd.f32 %v528_v13, %v482_v12 }
 0x1e8   : > { %v798_v15 = vpop.eup %797  ;;  %537 = vst.msk [vmem:[%s1035_s14 + $0x10] sm:$0xff] %vm534_vm4, %v529_v14  ;;  %v776_v16 = vmul.f32 -1.442695, %v529_v14 }
 0x1e9   : > { %v800_v17 = vpop.eup %799  ;;  %v552_v18 = vadd.f32 1.0, %v798_v15 }
 0x1ea   : > { %801 = vpow2.f32 %v776_v16  ;;  %v556_v19 = vmul.f32 %v800_v17, %v551_v11  ;;  %vm561_vm5 = vweird.f32 %v800_v17 }
 0x1eb   : > { %803 = vrcp.f32 %v552_v18  ;;  %vm562_vm7 = vmor %vm560_vm6, %vm561_vm5  ;;  %v581_v45 = vand.u32 2147483648, %v552_v18  ;;  %v579_v47 = vand.u32 2147483647, %v552_v18  ;;  %vm575_vm10 = vweird.f32 %v552_v18 }
 0x1ec   : > { %v557_v21 = vsub.f32 1.0, %v556_v19 }
 0x1ed   : > { %v531_v22 = vpop.f32.mrf.mxu2  ;;  %v582_v52 = vor.u32 1.1754944e-38, %v581_v45  ;;  %vm580_vm12 = vcmp.eq.f32.partialorder %v579_v47, 8.507059e+37 }
 0x1ee   : > { %v532_v24 = vadd.f32 %v531_v22, %v485_v20  ;;  %v558_v25 = vmul.f32 %v800_v17, %v557_v21 }
 0x1f0   : > { %v802_v27 = vpop.eup %801  ;;  %538 = vst.msk [vmem:[%s1035_s14 + $0x18] sm:$0xff] %vm534_vm4, %v532_v24  ;;  %v777_v28 = vmul.f32 -1.442695, %v532_v24  ;;  %v559_v29 = vadd.f32 %v800_v17, %v558_v25 }
 0x1f1   : > { %v804_v30 = vpop.eup %803  ;;  %v553_v31 = vadd.f32 1.0, %v802_v27 }
 0x1f2   : > { %805 = vpow2.f32 %v777_v28  ;;  %v563_v41 = vsel %vm562_vm7, %v800_v17, %v559_v29  ;;  %v571_v42 = vmul.f32 %v804_v30, %v552_v18  ;;  %vm576_vm9 = vweird.f32 %v804_v30 }
 0x1f3   : > { %807 = vrcp.f32 %v553_v31  ;;  %v568_v43 = vsel %vm565_vm8, %v567_v40, %v563_v41  ;;  %vm577_vm11 = vmor %vm575_vm10, %vm576_vm9  ;;  %v596_v57 = vand.u32 2147483648, %v553_v31  ;;  %v594_v59 = vand.u32 2147483647, %v553_v31 }
 0x1f4   : > { %617 = vperm.xlu0 %793, %v568_v43   ;;  %v572_v44 = vsub.f32 1.0, %v571_v42  ;;  %vm590_vm14 = vweird.f32 %v553_v31 }
 0x1f5   : > { %v597_v62 = vor.u32 1.1754944e-38, %v596_v57  ;;  %vm595_vm0 = vcmp.eq.f32.partialorder %v594_v59, 8.507059e+37 }
 0x1f6   : > { %v573_v46 = vmul.f32 %v804_v30, %v572_v44 }
 0x1f8   : > { %v806_v48 = vpop.eup %805  ;;  %v574_v49 = vadd.f32 %v804_v30, %v573_v46 }
 0x1f9   : > { %v808_v50 = vpop.eup %807  ;;  %v554_v51 = vadd.f32 1.0, %v806_v48 }
 0x1fa   : > { %v578_v53 = vsel %vm577_vm11, %v804_v30, %v574_v49  ;;  %v586_v54 = vmul.f32 %v808_v50, %v553_v31  ;;  %vm591_vm13 = vweird.f32 %v808_v50 }
 0x1fb   : > { %809 = vrcp.f32 %v554_v51  ;;  %v583_v55 = vsel %vm580_vm12, %v582_v52, %v578_v53  ;;  %vm592_vm15 = vmor %vm590_vm14, %vm591_vm13  ;;  %v611_v3 = vand.u32 2147483648, %v554_v51  ;;  %v609_v5 = vand.u32 2147483647, %v554_v51 }
 0x1fc   : > { %622 = vperm.xlu0 %793, %v583_v55   ;;  %v587_v56 = vsub.f32 1.0, %v586_v54  ;;  %vm605_vm2 = vweird.f32 %v554_v51 }
 0x1fd   : > { %v612_v7 = vor.u32 1.1754944e-38, %v611_v3  ;;  %vm610_vm4 = vcmp.eq.f32.partialorder %v609_v5, 8.507059e+37 }
 0x1fe   : > { %v588_v58 = vmul.f32 %v808_v50, %v587_v56 }
 0x200   : > { %v589_v60 = vadd.f32 %v808_v50, %v588_v58 }
 0x201   : > { %v810_v61 = vpop.eup %809 }
 0x202   : > { %v593_v63 = vsel %vm592_vm15, %v808_v50, %v589_v60  ;;  %v601_v0 = vmul.f32 %v810_v61, %v554_v51  ;;  %vm606_vm1 = vweird.f32 %v810_v61 }
 0x203   : > { %v598_v1 = vsel %vm595_vm0, %v597_v62, %v593_v63  ;;  %vm607_vm3 = vmor %vm605_vm2, %vm606_vm1 }
 0x204   : > { %627 = vperm.xlu1 %794, %v598_v1   ;;  %v602_v2 = vsub.f32 1.0, %v601_v0 }
 0x206   : > { %v603_v4 = vmul.f32 %v810_v61, %v602_v2 }
 0x208   : > { %v604_v6 = vadd.f32 %v810_v61, %v603_v4 }
 0x20a   : > { %v608_v8 = vsel %vm607_vm3, %v810_v61, %v604_v6 }
 0x20b   : > { %v613_v9 = vsel %vm610_vm4, %v612_v7, %v608_v8 }
 0x20c   : > { %632 = vperm.xlu1 %794, %v613_v9  }
 0x266   : > { %v618_v10 = vpop.permute.xlu0 %617 }
 0x267   : > { %v635_v11 = vmul.f32 %v618_v10, %v976_v32  ;;  %v636_v12 = vmul.f32 %v618_v10, %v978_v33 }
 0x269   : > { %643 = vst [vmem:[%s306_s17] sm:$0xff] %v635_v11 }
 0x26a   : > { %644 = vst [vmem:[%s306_s17 + $0x8] sm:$0xff] %v636_v12 }
 0x26e   : > { %v623_v13 = vpop.permute.xlu0 %622 }
 0x26f   : > { %v637_v14 = vmul.f32 %v623_v13, %v982_v34  ;;  %v638_v15 = vmul.f32 %v623_v13, %v984_v35 }
 0x271   : > { %645 = vst [vmem:[%s306_s17 + $0x10] sm:$0xff] %v637_v14 }
 0x272   : > { %646 = vst [vmem:[%s306_s17 + $0x18] sm:$0xff] %v638_v15 }
 0x276   : > { %v628_v16 = vpop.permute.xlu1 %627 }
 0x277   : > { %v639_v17 = vmul.f32 %v628_v16, %v988_v36  ;;  %v640_v18 = vmul.f32 %v628_v16, %v990_v37 }
 0x279   : > { %647 = vst [vmem:[%s306_s17 + $0x20] sm:$0xff] %v639_v17 }
 0x27a   : > { %648 = vst [vmem:[%s306_s17 + $0x28] sm:$0xff] %v640_v18 }
 0x27e   : > { %v633_v19 = vpop.permute.xlu1 %632 }
 0x27f   : > { %v641_v32 = vmul.f32 %v633_v19, %v994_v38  ;;  %v642_v33 = vmul.f32 %v633_v19, %v996_v39 }
 0x281   : > { %649 = vst [vmem:[%s306_s17 + $0x30] sm:$0xff] %v641_v32 }
 0x282   : > { %650 = vst [vmem:[%s306_s17 + $0x38] sm:$0xff] %v642_v33 }
 0x283 PF: > { %s18_s24 = sadd.s32 1, %s817_s24  }
 0x284   : > { %p15_p4 = scmp.ge.s32.totalorder %s18_s24, 4  }
 0x286   :  { %17 = sbr.rel (!%p15_p4) target bundleno = 1 (0x1), region = 89 }

</bundles_post_ra>
